<compile_context>
chip_gen: v6e
topology: v6e:2x2x1
jax: 0.10.0
libtpu: 0.0.40
codegen_flags: <defaults>
</compile_context>

<pallas_src>
import math

import jax
import jax.numpy as jnp
from jax.experimental import pallas as pl
from jax.experimental.pallas import tpu as pltpu


def _normalize2mom_const(act, n_grid: int = 200_001, lim: float = 10.0) -> float:
    """Deterministic e3nn normalize2mom: 1/sqrt(E_{z~N(0,1)}[act(z)^2]) via quadrature."""
    z = jnp.linspace(-lim, lim, n_grid, dtype=jnp.float32)
    pdf = jnp.exp(-0.5 * z * z) / jnp.sqrt(2.0 * jnp.float32(jnp.pi))
    second_moment = jnp.trapezoid(act(z) ** 2 * pdf, z)
    return float(second_moment ** -0.5)


def _default_pack_factor() -> int:
    """G atoms per packed MXU row: 4 fills the 256-wide MXU (v6e/v7x), 2 the 128-wide one."""
    try:
        kind = jax.devices()[0].device_kind.lower()
    except Exception:
        return 4
    if any(v in kind for v in ("v2", "v3", "v4", "v5")):
        return 2
    return 4


def _block_diag(w, g: int):
    """g copies of w [a,b] on the diagonal of a [g*a, g*b] matrix (one-time wrapper prep)."""
    a, b = w.shape
    out = jnp.zeros((g * a, g * b), dtype=w.dtype)
    for i in range(g):
        out = out.at[i * a:(i + 1) * a, i * b:(i + 1) * b].set(w)
    return out


def _choose_tile_rows(n_pack: int, target: int) -> int:
    """Packed-row tile: big (amortize ~0.35us/step), 8-aligned, grid >= 2 when feasible."""
    tile = max(1, min(target, n_pack))
    if tile < n_pack:
        tile = ((tile + 7) // 8) * 8
    # Give both v7x TensorCores work when there is enough to split.
    if n_pack >= 16 and pl.cdiv(n_pack, tile) < 2:
        tile = ((pl.cdiv(n_pack, 2) + 7) // 8) * 8
    return tile


def _mlp_kernel(x_ref, w1_ref, w2_ref, w3_ref, o_ref):
    # Weights arrive scale-folded + block-diagonal + bf16 (constant index_maps -> VMEM
    # resident across the grid).  bf16 x bf16 MXU passes, f32 accumulation, f32 silu.
    # NOTE: silu stays jax.nn.silu (EUP sigmoid); swap to x*pl.reciprocal(1+exp(-x),
    # approx=True) only if a bundle dump shows the VALU slot saturating.
    x = x_ref[...].astype(jnp.bfloat16)
    h = jax.nn.silu(jnp.dot(x, w1_ref[...], preferred_element_type=jnp.float32))
    h = jax.nn.silu(jnp.dot(h.astype(jnp.bfloat16), w2_ref[...],
                            preferred_element_type=jnp.float32))
    y = jnp.dot(h.astype(jnp.bfloat16), w3_ref[...], preferred_element_type=jnp.float32)
    o_ref[...] = y.astype(o_ref.dtype)


def fcn_e3nn_forward(x, w1, w2, w3, act_const, *, tile_n=4096, pack=None):
    n, d_in = x.shape
    h1 = w1.shape[1]
    h2 = w2.shape[1]
    d_out = w3.shape[1]
    assert w1.shape == (d_in, h1) and w2.shape == (h1, h2) and w3.shape == (h2, d_out)

    g = _default_pack_factor() if pack is None else pack

    # One-time prep (outside the kernel):
    #  1) fold 1/sqrt(fan_in) and the normalize2mom constant into the weights, in f32
    #     (matches the reference, which upcasts before dividing),
    #  2) replicate block-diagonally so G atoms share one MXU pass,
    #  3) cast to bf16 MXU operands.
    w1f = w1.astype(jnp.float32) * (1.0 / math.sqrt(d_in))
    w2f = w2.astype(jnp.float32) * (act_const / math.sqrt(h1))
    w3f = w3.astype(jnp.float32) * (act_const / math.sqrt(h2))
    w1p = _block_diag(w1f, g).astype(jnp.bfloat16)
    w2p = _block_diag(w2f, g).astype(jnp.bfloat16)
    w3p = _block_diag(w3f, g).astype(jnp.bfloat16)

    # Lane-pack G consecutive atoms per row (contiguous reshape -> no data movement).
    n_pack = pl.cdiv(n, g)
    n_round = n_pack * g
    if n_round != n:
        # TODO(synk): handle the n % G tail with a masked remainder call instead of padding.
        x = jnp.pad(x, ((0, n_round - n), (0, 0)))
    x_pack = x.reshape(n_pack, g * d_in)

    tile_rows = _choose_tile_rows(n_pack, max(1, tile_n // g))
    grid = (pl.cdiv(n_pack, tile_rows),)

    itemsize = jnp.dtype(x.dtype).itemsize
    w_bytes = sum(int(w.size) * 2 for w in (w1p, w2p, w3p))  # bf16
    cost = pl.CostEstimate(
        flops=2 * n_pack * ((g * d_in) * (g * h1) + (g * h1) * (g * h2)
                            + (g * h2) * (g * d_out)),
        transcendentals=n_round * (h1 + h2),
        bytes_accessed=n_pack * g * (d_in + d_out) * itemsize + w_bytes,
    )

    out_pack = pl.pallas_call(
        _mlp_kernel,
        out_shape=jax.ShapeDtypeStruct((n_pack, g * d_out), x.dtype),
        grid_spec=pltpu.PrefetchScalarGridSpec(
            num_scalar_prefetch=0,
            grid=grid,
            in_specs=[
                pl.BlockSpec((tile_rows, g * d_in), lambda i: (i, 0)),
                pl.BlockSpec((g * d_in, g * h1), lambda i: (0, 0)),
                pl.BlockSpec((g * h1, g * h2), lambda i: (0, 0)),
                pl.BlockSpec((g * h2, g * d_out), lambda i: (0, 0)),
            ],
            out_specs=pl.BlockSpec((tile_rows, g * d_out), lambda i: (i, 0)),
        ),
        compiler_params=pltpu.CompilerParams(
            dimension_semantics=("parallel",)),
        cost_estimate=cost,
    )(x_pack, w1p, w2p, w3p)

    out = out_pack.reshape(n_round, d_out)  # free contiguous reinterpretation
    return out[:n] if n_round != n else out


def fcn_e3nn_reference(x, w1, w2, w3, act_const):
    """Pure-JAX reference mirroring e3nn FullyConnectedNet forward (f32)."""
    x = x.astype(jnp.float32)
    h = act_const * jax.nn.silu(x @ (w1.astype(jnp.float32) / math.sqrt(w1.shape[0])))
    h = act_const * jax.nn.silu(h @ (w2.astype(jnp.float32) / math.sqrt(w2.shape[0])))
    return h @ (w3.astype(jnp.float32) / math.sqrt(w3.shape[0]))


if __name__ == "__main__":
    # Module config: irreps_in = "32x0e" (all scalars) -> inp_dim = 32,
    # hidden_neurons = [64, 64], dim_out = 16, activation = SiLU.
    n_atoms = 1024       # divisible by G in {2,4}; exercises a >=2-step row grid
    inp_dim = 32
    hidden = [64, 64]
    dim_out = 16

    act_const = _normalize2mom_const(jax.nn.silu)

    key = jax.random.PRNGKey(0)
    kx, k1, k2, k3 = jax.random.split(key, 4)
    x = jax.random.normal(kx, (n_atoms, inp_dim), dtype=jnp.float32)
    w1 = jax.random.normal(k1, (inp_dim, hidden[0]), dtype=jnp.float32)
    w2 = jax.random.normal(k2, (hidden[0], hidden[1]), dtype=jnp.float32)
    w3 = jax.random.normal(k3, (hidden[1], dim_out), dtype=jnp.float32)

    out = jax.block_until_ready(fcn_e3nn_forward(x, w1, w2, w3, act_const))
    ref = fcn_e3nn_reference(x, w1, w2, w3, act_const)

    assert out.shape == (n_atoms, dim_out)
    # bf16 MXU operands (f32 accumulation) -> relax tolerance vs the f32 reference.
    max_err = float(jnp.max(jnp.abs(out - ref)))
    assert jnp.allclose(out, ref, atol=3e-2, rtol=3e-2), f"max abs err = {max_err}"

    print("KERNEL_OK")
</pallas_src>

<mosaic_0001>
module attributes {stable_mosaic.version = 11 : i64} {
  func.func @_mlp_kernel(%arg0: i32, %arg1: memref<128x128xf32, #tpu.memory_space<vmem>>, %arg2: memref<128x256xbf16, #tpu.memory_space<vmem>>, %arg3: memref<256x256xbf16, #tpu.memory_space<vmem>>, %arg4: memref<256x64xbf16, #tpu.memory_space<vmem>>, %arg5: memref<128x64xf32, #tpu.memory_space<vmem>>) attributes {dimension_semantics = [#tpu.dimension_semantics<parallel>], iteration_bounds = array<i64: 2>, scalar_prefetch = 0 : i64, scratch_operands = 0 : i64, tpu.core_type = #tpu.core_type<tc>, window_params = [{transform_indices = @transform_0, window_bounds = array<i64: 128, 128>}, {pipeline_mode = #tpu.pipeline_mode<synchronous>, transform_indices = @transform_1, window_bounds = array<i64: 128, 256>}, {pipeline_mode = #tpu.pipeline_mode<synchronous>, transform_indices = @transform_2, window_bounds = array<i64: 256, 256>}, {pipeline_mode = #tpu.pipeline_mode<synchronous>, transform_indices = @transform_3, window_bounds = array<i64: 256, 64>}, {transform_indices = @transform_4, window_bounds = array<i64: 128, 64>}]} {
    %c0 = arith.constant 0 : index
    %c0_0 = arith.constant 0 : index
    %0 = vector.load %arg1[%c0, %c0_0] : memref<128x128xf32, #tpu.memory_space<vmem>>, vector<128x128xf32>
    %1 = arith.truncf %0 : vector<128x128xf32> to vector<128x128xbf16>
    %c0_1 = arith.constant 0 : index
    %c0_2 = arith.constant 0 : index
    %2 = vector.load %arg2[%c0_1, %c0_2] : memref<128x256xbf16, #tpu.memory_space<vmem>>, vector<128x256xbf16>
    %cst = arith.constant dense<0.000000e+00> : vector<128x256xf32>
    %3 = tpu.matmul %1, %2, %cst {dimension_numbers = #tpu.dot_dimension_numbers<[1], [0], [0], [1], [0, 0, 1, 1], [], []>} : vector<128x128xbf16>, vector<128x256xbf16>, vector<128x256xf32> -> vector<128x256xf32>
    %4 = arith.negf %3 : vector<128x256xf32>
    %5 = math.exp %4 : vector<128x256xf32>
    %cst_3 = arith.constant 1.000000e+00 : f32
    %6 = vector.broadcast %cst_3 : f32 to vector<128x256xf32>
    %7 = arith.addf %6, %5 : vector<128x256xf32>
    %8 = arith.divf %6, %7 : vector<128x256xf32>
    %9 = arith.mulf %3, %8 : vector<128x256xf32>
    %10 = arith.truncf %9 : vector<128x256xf32> to vector<128x256xbf16>
    %c0_4 = arith.constant 0 : index
    %c0_5 = arith.constant 0 : index
    %11 = vector.load %arg3[%c0_4, %c0_5] : memref<256x256xbf16, #tpu.memory_space<vmem>>, vector<256x256xbf16>
    %cst_6 = arith.constant dense<0.000000e+00> : vector<128x256xf32>
    %12 = tpu.matmul %10, %11, %cst_6 {dimension_numbers = #tpu.dot_dimension_numbers<[1], [0], [0], [1], [0, 0, 1, 1], [], []>} : vector<128x256xbf16>, vector<256x256xbf16>, vector<128x256xf32> -> vector<128x256xf32>
    %13 = arith.negf %12 : vector<128x256xf32>
    %14 = math.exp %13 : vector<128x256xf32>
    %cst_7 = arith.constant 1.000000e+00 : f32
    %15 = vector.broadcast %cst_7 : f32 to vector<128x256xf32>
    %16 = arith.addf %15, %14 : vector<128x256xf32>
    %17 = arith.divf %15, %16 : vector<128x256xf32>
    %18 = arith.mulf %12, %17 : vector<128x256xf32>
    %19 = arith.truncf %18 : vector<128x256xf32> to vector<128x256xbf16>
    %c0_8 = arith.constant 0 : index
    %c0_9 = arith.constant 0 : index
    %20 = vector.load %arg4[%c0_8, %c0_9] : memref<256x64xbf16, #tpu.memory_space<vmem>>, vector<256x64xbf16>
    %cst_10 = arith.constant dense<0.000000e+00> : vector<128x64xf32>
    %21 = tpu.matmul %19, %20, %cst_10 {dimension_numbers = #tpu.dot_dimension_numbers<[1], [0], [0], [1], [0, 0, 1, 1], [], []>} : vector<128x256xbf16>, vector<256x64xbf16>, vector<128x64xf32> -> vector<128x64xf32>
    %c0_11 = arith.constant 0 : index
    %c0_12 = arith.constant 0 : index
    %22 = vector.load %arg5[%c0_11, %c0_12] : memref<128x64xf32, #tpu.memory_space<vmem>>, vector<128x64xf32>
    tpu.vector_store %arg5[%c0_11, %c0_12], %21 {strides = array<i32>} : memref<128x64xf32, #tpu.memory_space<vmem>>, vector<128x64xf32>,
    return
  }
  func.func @transform_0(%arg0: i32) -> (i32, i32) {
    %c0_i32 = arith.constant 0 : i32
    %c0_i32_0 = arith.constant 0 : i32
    return %arg0, %c0_i32 : i32, i32
  }
  func.func @transform_1(%arg0: i32) -> (i32, i32) {
    %c0_i32 = arith.constant 0 : i32
    %c0_i32_0 = arith.constant 0 : i32
    %c0_i32_1 = arith.constant 0 : i32
    return %c0_i32, %c0_i32_0 : i32, i32
  }
  func.func @transform_2(%arg0: i32) -> (i32, i32) {
    %c0_i32 = arith.constant 0 : i32
    %c0_i32_0 = arith.constant 0 : i32
    %c0_i32_1 = arith.constant 0 : i32
    return %c0_i32, %c0_i32_0 : i32, i32
  }
  func.func @transform_3(%arg0: i32) -> (i32, i32) {
    %c0_i32 = arith.constant 0 : i32
    %c0_i32_0 = arith.constant 0 : i32
    %c0_i32_1 = arith.constant 0 : i32
    return %c0_i32, %c0_i32_0 : i32, i32
  }
  func.func @transform_4(%arg0: i32) -> (i32, i32) {
    %c0_i32 = arith.constant 0 : i32
    %c0_i32_0 = arith.constant 0 : i32
    return %arg0, %c0_i32 : i32, i32
  }
}

</mosaic_0001>

<bundles_post_ra>
// kernel: tpu_custom_call.1
= control target key start
LH: loop header
LB: loop body
LE: loop exit
PB: predicated region body
PF: predicated region fallthrough
CT: control target
= control target key end

     0   :  { %9 = vsyncpa [#allocation3], 0  ;;  %s2869_s0 = inlined_call_operand.hbm [shape: f32[256,128], index: 0, kind: input, shape index: {}]   ;;  %s2870_s1 = inlined_call_operand.vmem [shape: bf16[128,256], index: 1, kind: input, shape index: {}]   ;;  %s2871_s2 = inlined_call_operand.hbm [shape: bf16[256,256], index: 2, kind: input, shape index: {}]   ;;  %s2872_s3 = inlined_call_operand.vmem [shape: bf16[256,64], index: 3, kind: input, shape index: {}]   ;;  %s2873_s4 = inlined_call_operand.vmem [shape: f32[256,64], index: 4, kind: output, shape index: {}]  }
   0x1   :  { %11 = vsyncpa [#allocation3 + $0x1], 0 }
   0x2   :  { %12 = vsyncpa [#allocation5], 0  ;;  %s2318_s15 = smov 0   ;;  %s2320_s16 = smov 0  }
   0x3   :  { %s2322_s17 = smov 0   ;;  %s2324_s18 = smov 0  }
   0x4 LB: > { %s1573_s19 = sadd.s32 4294967295, %s2286_s18   ;;  %p38_p0 = scmp.ne.s32.totalorder %s2278_s16, %s2274_s15  ;;  %s2286_s18 = sphi %s2324_s18, %s2889_s18   ;;  %s2282_s17 = sphi %s2322_s17, %s2888_s17   ;;  %s2278_s16 = sphi %s2320_s16, %s2887_s16   ;;  %s2274_s15 = sphi %s2318_s15, %s2886_s15  }
   0x5   : > { %p2340_p1 = scmp.eq.s32.totalorder %s1573_s19, 0  ;;  %p1575_p2 = scmp.ge.s32.totalorder %s2286_s18, 1 }
   0x6   : > { %p138_p3 = scmp.lt.s32.totalorder %s2286_s18, 3  ;;  %s2288_s23 = smov [#allocation4]  }
   0x7   : > { %s2878_s20 = scalar_select %p2340_p1, 1, 0 }
   0x8   : > { %p2348_p4 = por %p2340_p1, %p38_p0  ;;  %p2352_p5 = pnand %p1575_p2, %p138_p3 }
   0x9   : > { %s153_s24 = sshll.u32 %s2288_s23, 4  ;;  %s2365_s26 = sadd.s32 1, %s2286_s18   ;;  %s154_s24 = int_to_ptr.vmem [resolvable:$true] %s153_s24 }
   0xa   : > { %s2879_s21 = scalar_select %p2348_p4, 1, 0 }
   0xb   : > { %s2880_s22 = scalar_select %p2352_p5, 1, 0 }
   0xc   : > { %p1803_p6 = pneg %p2352_p5  ;;  %s25_s27 = sadd.s32 1, %s2282_s17 }
   0xd   : > { %s22_s28 = ssub.s32 %s2286_s18, %s2365_s26  ;;  %s2205_s29 = scalar_lea.vmem %s154_s24, 4096 }
   0xe   : > { %p2360_p7 = pnand %p1803_p6, %p2340_p1  ;;  %p2206_p9 = scmp.ne.s32.totalorder %s154_s24, %s2205_s29 }
   0xf   : > { %p2213_p12 = scmp.lt.s32.totalorder %s154_s24, %s154_s24  ;;  %p2214_p13 = scmp.lt.s32.totalorder %s2205_s29, %s2205_s29 }
  0x10   : > { %p2196_p8 = pneg %p2360_p7 }
  0x11   : > { %p2215_p0 = por %p2214_p13, %p2213_p12 }
  0x12   : > { %p2208_p10 = pnand %p2206_p9, %p2196_p8 }
  0x14   : > { %p2209_p11 = pneg %p2208_p10 }
  0x16   : > { %p2216_p2 = pnand %p2215_p0, %p2209_p11 }
  0x18   : > { %2219 = shalt.err (!%p2216_p2)
}
  0x19   : > { %s2289_s30 = smov 128   ;;  %s2290_s5 = smov 8  }
  0x1a   : > { %1806 = dma.hbm_to_vmem [thread:$0]  (!%p2360_p7), %s2871_s2, 4096, %s154_s24, [#allocation5], %s2289_s30, %s2289_s30, %s2290_s5  }
  0x1b   : > { %p23_p3 = scmp.eq.s32.totalorder %s22_s28, 0  ;;  %p32_p6 = scmp.ne.s32.totalorder %s2282_s17, %s2278_s16 }
  0x1c   : > { %p33_p8 = scmp.eq.s32.totalorder %s2286_s18, 0  ;;  %p1812_p9 = scmp.lt.s32.totalorder %s2286_s18, 2 }
  0x1d   : > { %s2385_s8 = scalar_select %p23_p3, %s2282_s17, %s25_s27  }
  0x1e   : > { %p34_p10 = por %p33_p8, %p32_p6  ;;  %s170_s9 = sand.u32 1, %s2282_s17  }
  0x1f   : > { %s1578_s10 = sshll.u32 %s170_s9, 7  ;;  %s1716_s11 = sshll.u32 %s2286_s18, 11 }
  0x20   : > { %s2392_s14 = scalar_lea.hbm %s2869_s0, %s1716_s11  ;;  %s174_s15 = scalar_lea.vmem [#allocation2], %s1578_s10 }
  0x21   : > { %s181_s23 = sshll.u32 %s174_s15, 4  ;;  %p2396_p7 = pnand %p1812_p9, %p34_p10  ;;  %s2394_s23 = int_to_ptr.vmem [resolvable:$true] %s181_s23 }
  0x22   : > { %s2400_s25 = scalar_lea.sflag [#allocation3], %s170_s9  ;;  %s2220_s27 = scalar_lea.hbm %s2392_s14, 2048 }
  0x23   : > { %p2221_p11 = scmp.ne.s32.totalorder %s2392_s14, %s2220_s27  ;;  %p2222_p12 = pneg %p2396_p7 }
  0x24   : > { %s2225_s6 = scalar_lea.hbm %s2869_s0, 4096  ;;  %p2226_p2 = scmp.lt.s32.totalorder %s2392_s14, %s2869_s0 }
  0x25   : > { %p2223_p13 = pnand %p2222_p12, %p2221_p11  ;;  %p2227_p3 = scmp.lt.s32.totalorder %s2225_s6, %s2220_s27 }
  0x27   : > { %p2224_p0 = pneg %p2223_p13  ;;  %p2228_p6 = por %p2227_p3, %p2226_p2 }
  0x29   : > { %p2229_p8 = pnand %p2228_p6, %p2224_p0 }
  0x2b   : > { %2232 = shalt.err (!%p2229_p8)
}
  0x2c   : > { %s2233_s9 = scalar_lea.vmem %s2394_s23, 2048  ;;  %s2291_s11 = smov [#allocation2]  }
  0x2d   : > { %p2234_p9 = scmp.ne.s32.totalorder %s2394_s23, %s2233_s9  ;;  %s2238_s12 = sshll.u32 %s2291_s11, 4  ;;  %s2239_s12 = int_to_ptr.vmem [resolvable:$false] %s2238_s12 }
  0x2e   : > { %s2240_s13 = scalar_lea.vmem %s2239_s12, 4096  ;;  %p2241_p13 = scmp.lt.s32.totalorder %s2394_s23, %s2239_s12 }
  0x2f   : > { %p2236_p10 = pnand %p2234_p9, %p2222_p12  ;;  %p2242_p1 = scmp.lt.s32.totalorder %s2240_s13, %s2233_s9 }
  0x31   : > { %p2237_p11 = pneg %p2236_p10  ;;  %p2243_p4 = por %p2242_p1, %p2241_p13 }
  0x33   : > { %p2244_p5 = pnand %p2243_p4, %p2237_p11 }
  0x35   : > { %2247 = shalt.err (!%p2244_p5)
}
  0x36   : > { %1810 = dma.hbm_to_vmem [thread:$0]  (!%p2396_p7), %s2392_s14, 2048, %s2394_s23, %s2400_s25, %s2289_s30, %s2289_s30, %s2290_s5  }
  0x37   : > { %p2883_p12 = scmp.ne.s32.totalorder %s2880_s22, 0 }
  0x38   : > { %s195_s15 = sand.u32 (!%p2883_p12), 1, %s2278_s16   ;;  %p2884_p1 = scmp.ne.s32.totalorder (!%p2883_p12), %s2879_s21, 0 }
  0x39   : > { %193 = sbr.rel (%p2883_p12) target bundleno = 830 (0x33e), region = 36  ;;  %s1582_s27 = sshll.u32 (!%p2883_p12), %s195_s15, 7 }
  0x3a   : > { %s196_s28 = scalar_lea.sflag (!%p2883_p12), [#allocation3], %s195_s15  ;;  %s2427_s29 = scalar_lea.vmem (!%p2883_p12), [#allocation2], %s1582_s27 }
  0x3e   : > { %2265 = dma.done.wait (%p2884_p1), %s196_s28, 2048  }
  0x3f   : > { %2267 = vsyncadd (%p2884_p1), %s196_s28, 4294965248  ;;  %p2885_p4 = scmp.ne.s32.totalorder %s2878_s20, 0 }
  0x41   : > { %2269 = dma.done.wait (%p2885_p4), [#allocation5], 4096  }
  0x42   : > { %2271 = vsyncadd (%p2885_p4), [#allocation5], 4294963200  ;;  %v2292_v0 = vmov 0   ;;  %v1850_v1 = vld [vmem:[%s2870_s1 + $0x74] ss:$8 sps:$4 sm:$0xff]   ;;  %v236_v24 = vld [vmem:[%s2427_s29] sm:$0xff] }
  0x43   : > { %388 = vmatprep.mubr.bf16.mxu0 %v2292_v0  ;;  %v1852_v2 = vld [vmem:[%s2870_s1 + $0x70] ss:$8 sps:$4 sm:$0xff]   ;;  %356 = vmatprep.subr.bf16.mxu0 %v1850_v1  ;;  %v1853_v3 = vld [vmem:[%s2870_s1 + $0x64] ss:$8 sps:$4 sm:$0xff]   ;;  %v1855_v4 = vld [vmem:[%s2870_s1 + $0x60] ss:$8 sps:$4 sm:$0xff]  }
  0x44   : > { %357 = vmatpush1.bf16.msra.mxu0 %v1852_v2  ;;  %v1856_v5 = vld [vmem:[%s2870_s1 + $0x54] ss:$8 sps:$4 sm:$0xff]   ;;  %v1858_v6 = vld [vmem:[%s2870_s1 + $0x50] ss:$8 sps:$4 sm:$0xff]   ;;  %v1859_v7 = vld [vmem:[%s2870_s1 + $0x44] ss:$8 sps:$4 sm:$0xff]  }
  0x45   : > { %358 = vmatprep.subr.bf16.mxu0 %v1853_v3  ;;  %v1861_v8 = vld [vmem:[%s2870_s1 + $0x40] ss:$8 sps:$4 sm:$0xff]   ;;  %v1862_v9 = vld [vmem:[%s2870_s1 + $0x34] ss:$8 sps:$4 sm:$0xff]   ;;  %v1864_v10 = vld [vmem:[%s2870_s1 + $0x30] ss:$8 sps:$4 sm:$0xff]  }
  0x46   : > { %v1865_v11 = vld [vmem:[%s2870_s1 + $0x24] ss:$8 sps:$4 sm:$0xff]   ;;  %v1874_v12 = vld [vmem:[#allocation4 + $0x74] ss:$8 sps:$4 sm:$0xff]   ;;  %v1876_v13 = vld [vmem:[#allocation4 + $0x70] ss:$8 sps:$4 sm:$0xff]  }
  0x47   : > { %v1867_v14 = vld [vmem:[%s2870_s1 + $0x20] ss:$8 sps:$4 sm:$0xff]   ;;  %901 = vmatprep.subr.bf16.mxu1 %v1874_v12  ;;  %v1877_v15 = vld [vmem:[#allocation4 + $0x64] ss:$8 sps:$4 sm:$0xff]   ;;  %v1868_v16 = vld [vmem:[%s2870_s1 + $0x14] ss:$8 sps:$4 sm:$0xff]  }
  0x48   : > { %359 = vmatpush1.bf16.msra.mxu0 %v1855_v4  ;;  %902 = vmatpush1.bf16.msra.mxu1 %v1876_v13  ;;  %v1879_v17 = vld [vmem:[#allocation4 + $0x60] ss:$8 sps:$4 sm:$0xff]   ;;  %v1880_v18 = vld [vmem:[#allocation4 + $0x54] ss:$8 sps:$4 sm:$0xff]   ;;  %v1870_v19 = vld [vmem:[%s2870_s1 + $0x10] ss:$8 sps:$4 sm:$0xff]  }
  0x49   : > { %360 = vmatprep.subr.bf16.mxu0 %v1856_v5  ;;  %903 = vmatprep.subr.bf16.mxu1 %v1877_v15  ;;  %v1871_v20 = vld [vmem:[%s2870_s1 + $0x4] ss:$8 sps:$4 sm:$0xff]   ;;  %v1882_v21 = vld [vmem:[#allocation4 + $0x50] ss:$8 sps:$4 sm:$0xff]   ;;  %v1873_v23 = vld [vmem:[%s2870_s1] ss:$8 sps:$4 sm:$0xff]  }
  0x4a   : > { %v1883_v22 = vld [vmem:[#allocation4 + $0x44] ss:$8 sps:$4 sm:$0xff]   ;;  %v1885_v26 = vld [vmem:[#allocation4 + $0x40] ss:$8 sps:$4 sm:$0xff]   ;;  %v1886_v27 = vld [vmem:[#allocation4 + $0x34] ss:$8 sps:$4 sm:$0xff]  }
  0x4b   : > { %v237_v25 = vld [vmem:[%s2427_s29 + $0x8] sm:$0xff]  ;;  %v1888_v28 = vld [vmem:[#allocation4 + $0x30] ss:$8 sps:$4 sm:$0xff]   ;;  %v240_v33 = vld [vmem:[%s2427_s29 + $0x20] sm:$0xff]  ;;  %s1584_s23 = sshll.u32 %s1573_s19, 4  ;;  %vm1479_vm0 = vcmask 523264  }
  0x4c   : > { %361 = vmatpush1.bf16.msra.mxu0 %v1858_v6  ;;  %904 = vmatpush1.bf16.msra.mxu1 %v1879_v17  ;;  %v252_v29 = vpack.c.bf16 %v237_v25, %v236_v24  ;;  %v238_v30 = vld [vmem:[%s2427_s29 + $0x10] sm:$0xff]  ;;  %v239_v31 = vld [vmem:[%s2427_s29 + $0x18] sm:$0xff]  ;;  %v241_v34 = vld [vmem:[%s2427_s29 + $0x28] sm:$0xff]  ;;  %p230_p5 = scmp.lt.s32.totalorder %s1584_s23, 31 }
  0x4d   : > { %362 = vmatprep.subr.bf16.mxu0 %v1859_v7  ;;  %905 = vmatprep.subr.bf16.mxu1 %v1880_v18  ;;  %v253_v32 = vpack.c.bf16 %v239_v31, %v238_v30  ;;  %v254_v35 = vpack.c.bf16 %v241_v34, %v240_v33  ;;  %v242_v36 = vld [vmem:[%s2427_s29 + $0x30] sm:$0xff]  ;;  %v243_v37 = vld [vmem:[%s2427_s29 + $0x38] sm:$0xff]  ;;  %v244_v39 = vld [vmem:[%s2427_s29 + $0x40] sm:$0xff] }
  0x4e   : > { %v255_v38 = vpack.c.bf16 %v243_v37, %v242_v36  ;;  %v245_v40 = vld [vmem:[%s2427_s29 + $0x48] sm:$0xff]  ;;  %v246_v42 = vld [vmem:[%s2427_s29 + $0x50] sm:$0xff]  ;;  %v247_v43 = vld [vmem:[%s2427_s29 + $0x58] sm:$0xff]  ;;  %s2891_s23 = smov (!%p230_p5, %s1584_s23), 31 }
  0x4f   : > { %v256_v41 = vpack.c.bf16 %v245_v40, %v244_v39  ;;  %v257_v44 = vpack.c.bf16 %v247_v43, %v246_v42  ;;  %v248_v45 = vld [vmem:[%s2427_s29 + $0x60] sm:$0xff]  ;;  %v249_v46 = vld [vmem:[%s2427_s29 + $0x68] sm:$0xff]  ;;  %v250_v48 = vld [vmem:[%s2427_s29 + $0x70] sm:$0xff]  ;;  %s1585_s24 = sshll.u32 %s2891_s23, 3 }
  0x50   : > { %363 = vmatpush1.bf16.msra.mxu0 %v1861_v8  ;;  %906 = vmatpush1.bf16.msra.mxu1 %v1882_v21  ;;  %v258_v47 = vpack.c.bf16 %v249_v46, %v248_v45  ;;  %v251_v49 = vld [vmem:[%s2427_s29 + $0x78] sm:$0xff]  ;;  %v1889_v51 = vld [vmem:[#allocation4 + $0x24] ss:$8 sps:$4 sm:$0xff]   ;;  %v1891_v52 = vld [vmem:[#allocation4 + $0x20] ss:$8 sps:$4 sm:$0xff]   ;;  %s2822_s6 = scalar_lea.vmem %s2873_s4, %s1585_s24 }
  0x51   : > { %364 = vmatprep.subr.bf16.mxu0 %v1862_v9  ;;  %907 = vmatprep.subr.bf16.mxu1 %v1883_v22  ;;  %v259_v50 = vpack.c.bf16 %v251_v49, %v250_v48  ;;  %v1892_v53 = vld [vmem:[#allocation4 + $0x14] ss:$8 sps:$4 sm:$0xff]   ;;  %v1894_v54 = vld [vmem:[#allocation4 + $0x10] ss:$8 sps:$4 sm:$0xff]   ;;  %v1895_v55 = vld [vmem:[#allocation4 + $0x4] ss:$8 sps:$4 sm:$0xff]  }
  0x52   : > { %v1897_v56 = vld [vmem:[#allocation4] ss:$8 sps:$4 sm:$0xff]   ;;  %v1898_v57 = vld [vmem:[#allocation4 + $0xf4] ss:$8 sps:$4 sm:$0xff]   ;;  %v1900_v58 = vld [vmem:[#allocation4 + $0xf0] ss:$8 sps:$4 sm:$0xff]  }
  0x53   : > { %v1901_v59 = vld [vmem:[#allocation4 + $0xe4] ss:$8 sps:$4 sm:$0xff]   ;;  %v1903_v60 = vld [vmem:[#allocation4 + $0xe0] ss:$8 sps:$4 sm:$0xff]   ;;  %v1904_v61 = vld [vmem:[#allocation4 + $0xd4] ss:$8 sps:$4 sm:$0xff]  }
  0x54   : > { %365 = vmatpush1.bf16.msra.mxu0 %v1864_v10  ;;  %908 = vmatpush1.bf16.msra.mxu1 %v1885_v26  ;;  %v1906_v62 = vld [vmem:[#allocation4 + $0xd0] ss:$8 sps:$4 sm:$0xff]   ;;  %v1907_v63 = vld [vmem:[#allocation4 + $0xc4] ss:$8 sps:$4 sm:$0xff]   ;;  %v1910_v1 = vld [vmem:[#allocation4 + $0xb4] ss:$8 sps:$4 sm:$0xff]  }
  0x55   : > { %366 = vmatprep.subr.bf16.mxu0 %v1865_v11  ;;  %909 = vmatprep.subr.bf16.mxu1 %v1886_v27  ;;  %v1912_v2 = vld [vmem:[#allocation4 + $0xb0] ss:$8 sps:$4 sm:$0xff]   ;;  %v1913_v3 = vld [vmem:[#allocation4 + $0xa4] ss:$8 sps:$4 sm:$0xff]   ;;  %v1915_v4 = vld [vmem:[#allocation4 + $0xa0] ss:$8 sps:$4 sm:$0xff]  }
  0x56   : > { %v1916_v5 = vld [vmem:[#allocation4 + $0x94] ss:$8 sps:$4 sm:$0xff]   ;;  %v1918_v6 = vld [vmem:[#allocation4 + $0x90] ss:$8 sps:$4 sm:$0xff]   ;;  %v1919_v7 = vld [vmem:[#allocation4 + $0x84] ss:$8 sps:$4 sm:$0xff]  }
  0x57   : > { %v1921_v8 = vld [vmem:[#allocation4 + $0x80] ss:$8 sps:$4 sm:$0xff]   ;;  %v1922_v9 = vld [vmem:[%s2872_s3 + $0x78] sm:$0xff]  }
  0x58   : > { %367 = vmatpush1.bf16.msra.mxu0 %v1867_v14  ;;  %910 = vmatpush1.bf16.msra.mxu1 %v1888_v28  ;;  %v2515_v10 = vld [vmem:[%s2872_s3 + $0x38] sm:$0xff]  }
  0x59   : > { %368 = vmatprep.subr.bf16.mxu0 %v1868_v16  ;;  %911 = vmatprep.subr.bf16.mxu1 %v1889_v51 }
  0x5c   : > { %369 = vmatpush1.bf16.msra.mxu0 %v1870_v19  ;;  %912 = vmatpush1.bf16.msra.mxu1 %v1891_v52 }
  0x5d   : > { %370 = vmatprep.subr.bf16.mxu0 %v1871_v20  ;;  %913 = vmatprep.subr.bf16.mxu1 %v1892_v53 }
  0x60   : > { %371 = vmatpush1.bf16.msra.mxu0 %v1873_v23  ;;  %914 = vmatpush1.bf16.msra.mxu1 %v1894_v54 }
  0x61   : > { %915 = vmatprep.subr.bf16.mxu1 %v1895_v55  ;;  %1717 = vmatprep.subr.bf16.mxu0 %v1922_v9 }
  0x63   : > { %389 = vmatmul.mubr.bf16.vlgmr.msra.gmra.mxu0 %v252_v29 }
  0x64   : > { %398 = vmatprep.mubr.bf16.mxu0 %v2292_v0  ;;  %916 = vmatpush1.bf16.msra.mxu1 %v1897_v56 }
  0x65   : > { %917 = vmatprep.subr.bf16.mxu1 %v1898_v57  ;;  %1718 = vmatpush3.bf16.msra.mxu0 %v2515_v10 }
  0x68   : > { %918 = vmatpush2.bf16.msra.mxu1 %v1900_v58 }
  0x69   : > { %919 = vmatprep.subr.bf16.mxu1 %v1901_v59 }
  0x6b   : > { %399 = vmatmul.mubr.bf16.gmra.mxu0 %v253_v32 }
  0x6c   : > { %408 = vmatprep.mubr.bf16.mxu0 %v2292_v0  ;;  %920 = vmatpush2.bf16.msra.mxu1 %v1903_v60 }
  0x6d   : > { %921 = vmatprep.subr.bf16.mxu1 %v1904_v61 }
  0x70   : > { %922 = vmatpush2.bf16.msra.mxu1 %v1906_v62 }
  0x71   : > { %923 = vmatprep.subr.bf16.mxu1 %v1907_v63 }
  0x73   : > { %409 = vmatmul.mubr.bf16.gmra.mxu0 %v254_v35 }
  0x74   : > { %418 = vmatprep.mubr.bf16.mxu0 %v2292_v0 }
  0x7b   : > { %419 = vmatmul.mubr.bf16.gmra.mxu0 %v255_v38 }
  0x7c   : > { %428 = vmatprep.mubr.bf16.mxu0 %v2292_v0 }
  0x83   : > { %429 = vmatmul.mubr.bf16.gmra.mxu0 %v256_v41 }
  0x84   : > { %438 = vmatprep.mubr.bf16.mxu0 %v2292_v0 }
  0x8b   : > { %439 = vmatmul.mubr.bf16.gmra.mxu0 %v257_v44 }
  0x8c   : > { %448 = vmatprep.mubr.bf16.mxu0 %v2292_v0 }
  0x93   : > { %449 = vmatmul.mubr.bf16.gmra.mxu0 %v258_v47 }
  0x94   : > { %458 = vmatprep.mubr.bf16.mxu0 %v2292_v0  ;;  %v1909_v0 = vld [vmem:[#allocation4 + $0xc0] ss:$8 sps:$4 sm:$0xff]  }
  0x95   : > { %924 = vmatpush2.bf16.msra.mxu1 %v1909_v0 }
  0x96   : > { %925 = vmatprep.subr.bf16.mxu1 %v1910_v1 }
  0x99   : > { %926 = vmatpush2.bf16.msra.mxu1 %v1912_v2 }
  0x9a   : > { %927 = vmatprep.subr.bf16.mxu1 %v1913_v3 }
  0x9b   : > { %459 = vmatmul.mubr.bf16.gmra.mxu0 %v259_v50 }
  0x9d   : > { %928 = vmatpush2.bf16.msra.mxu1 %v1915_v4 }
  0x9e   : > { %929 = vmatprep.subr.bf16.mxu1 %v1916_v5 }
  0xa1   : > { %930 = vmatpush2.bf16.msra.mxu1 %v1918_v6 }
  0xa2   : > { %931 = vmatprep.subr.bf16.mxu1 %v1919_v7 }
  0xa5   : > { %932 = vmatpush2.bf16.msra.mxu1 %v1921_v8 }
  0xa6   : > { %1781 = vmatprep.subr.bf16.mxu1 %v1922_v9 }
 0x123   : > { %v2518_v11 = vpop.f32.mrf.mxu0 }
 0x124   : > { %v1602_v12 = vmul.f32 -1.442695, %v2518_v11 }
 0x125   : > { %v2521_v13 = vpop.f32.mrf.mxu0 }
 0x126   : > { %1938 = vpow2.f32 %v1602_v12  ;;  %v1603_v14 = vmul.f32 -1.442695, %v2521_v13 }
 0x127   : > { %v2524_v15 = vpop.f32.mrf.mxu0 }
 0x128   : > { %1940 = vpow2.f32 %v1603_v14  ;;  %v1604_v16 = vmul.f32 -1.442695, %v2524_v15 }
 0x129   : > { %v2527_v17 = vpop.f32.mrf.mxu0 }
 0x12a   : > { %1942 = vpow2.f32 %v1604_v16  ;;  %v1605_v18 = vmul.f32 -1.442695, %v2527_v17 }
 0x12b   : > { %v2530_v19 = vpop.f32.mrf.mxu0 }
 0x12c   : > { %1944 = vpow2.f32 %v1605_v18  ;;  %v1606_v20 = vmul.f32 -1.442695, %v2530_v19 }
 0x12d   : > { %v2533_v21 = vpop.f32.mrf.mxu0 }
 0x12e   : > { %1946 = vpow2.f32 %v1606_v20  ;;  %v1607_v22 = vmul.f32 -1.442695, %v2533_v21 }
 0x12f   : > { %v2536_v23 = vpop.f32.mrf.mxu0 }
 0x130   : > { %1948 = vpow2.f32 %v1607_v22  ;;  %v1608_v24 = vmul.f32 -1.442695, %v2536_v23 }
 0x131   : > { %v2539_v25 = vpop.f32.mrf.mxu0 }
 0x132   : > { %1950 = vpow2.f32 %v1608_v24  ;;  %v1609_v26 = vmul.f32 -1.442695, %v2539_v25 }
 0x133   : > { %v1939_v27 = vpop.eup %1938  ;;  %v2542_v28 = vpop.f32.mrf.mxu0 }
 0x134   : > { %v565_v29 = vadd.f32 1.0, %v1939_v27  ;;  %1952 = vpow2.f32 %v1609_v26  ;;  %v1610_v30 = vmul.f32 -1.442695, %v2542_v28 }
 0x135   : > { %v1941_v31 = vpop.eup %1940  ;;  %v2545_v32 = vpop.f32.mrf.mxu0 }
 0x136   : > { %1954 = vrcp.f32 %v565_v29  ;;  %v566_v33 = vadd.f32 1.0, %v1941_v31  ;;  %v1611_v34 = vmul.f32 -1.442695, %v2545_v32 }
 0x137   : > { %v1943_v35 = vpop.eup %1942  ;;  %1956 = vpow2.f32 %v1610_v30  ;;  %v2548_v36 = vpop.f32.mrf.mxu0 }
 0x138   : > { %1958 = vrcp.f32 %v566_v33  ;;  %v567_v37 = vadd.f32 1.0, %v1943_v35  ;;  %v1612_v38 = vmul.f32 -1.442695, %v2548_v36 }
 0x139   : > { %v1945_v39 = vpop.eup %1944  ;;  %1960 = vpow2.f32 %v1611_v34  ;;  %v2551_v40 = vpop.f32.mrf.mxu0 }
 0x13a   : > { %1962 = vrcp.f32 %v567_v37  ;;  %v568_v41 = vadd.f32 1.0, %v1945_v39  ;;  %v1613_v42 = vmul.f32 -1.442695, %v2551_v40 }
 0x13b   : > { %v1947_v43 = vpop.eup %1946  ;;  %1964 = vpow2.f32 %v1612_v38  ;;  %v2554_v44 = vpop.f32.mrf.mxu0 }
 0x13c   : > { %1966 = vrcp.f32 %v568_v41  ;;  %v569_v45 = vadd.f32 1.0, %v1947_v43  ;;  %v1614_v46 = vmul.f32 -1.442695, %v2554_v44 }
 0x13d   : > { %v1949_v47 = vpop.eup %1948  ;;  %1968 = vpow2.f32 %v1613_v42  ;;  %v2557_v48 = vpop.f32.mrf.mxu0 }
 0x13e   : > { %1970 = vrcp.f32 %v569_v45  ;;  %v570_v49 = vadd.f32 1.0, %v1949_v47  ;;  %v1615_v50 = vmul.f32 -1.442695, %v2557_v48 }
 0x13f   : > { %v1951_v51 = vpop.eup %1950  ;;  %1972 = vpow2.f32 %v1614_v46  ;;  %v2560_v52 = vpop.f32.mrf.mxu0 }
 0x140   : > { %1974 = vrcp.f32 %v570_v49  ;;  %v571_v53 = vadd.f32 1.0, %v1951_v51  ;;  %v1616_v54 = vmul.f32 -1.442695, %v2560_v52 }
 0x141   : > { %v1953_v55 = vpop.eup %1952  ;;  %1976 = vpow2.f32 %v1615_v50  ;;  %v2563_v56 = vpop.f32.mrf.mxu0 }
 0x142   : > { %1978 = vrcp.f32 %v571_v53  ;;  %v572_v57 = vadd.f32 1.0, %v1953_v55  ;;  %v1617_v58 = vmul.f32 -1.442695, %v2563_v56 }
 0x143   : > { %v1955_v59 = vpop.eup %1954  ;;  %1980 = vpow2.f32 %v1616_v54  ;;  %v2566_v60 = vpop.f32.mrf.mxu0 }
 0x144   : > { %v1957_v61 = vpop.eup %1956  ;;  %1982 = vrcp.f32 %v572_v57  ;;  %v1618_v62 = vmul.f32 -1.442695, %v2566_v60  ;;  %v661_v27 = vmul.f32 %v1955_v59, %v2518_v11 }
 0x145   : > { %v1959_v63 = vpop.eup %1958  ;;  %v573_v0 = vadd.f32 1.0, %v1957_v61  ;;  %1984 = vpow2.f32 %v1617_v58  ;;  %v2569_v1 = vpop.f32.mrf.mxu0 }
 0x146   : > { %v1961_v2 = vpop.eup %1960  ;;  %1986 = vpow2.f32 %v1618_v62  ;;  %v1619_v3 = vmul.f32 -1.442695, %v2569_v1  ;;  %v662_v20 = vmul.f32 %v1959_v63, %v2521_v13 }
 0x147   : > { %v1963_v4 = vpop.eup %1962  ;;  %1988 = vrcp.f32 %v573_v0  ;;  %v574_v5 = vadd.f32 1.0, %v1961_v2  ;;  %v2572_v6 = vpop.f32.mrf.mxu0 }
 0x148   : > { %v1965_v7 = vpop.eup %1964  ;;  %1990 = vpow2.f32 %v1619_v3  ;;  %v1620_v8 = vmul.f32 -1.442695, %v2572_v6  ;;  %v663_v12 = vmul.f32 %v1963_v4, %v2524_v15 }
 0x149   : > { %v1967_v9 = vpop.eup %1966  ;;  %1992 = vrcp.f32 %v574_v5  ;;  %v575_v14 = vadd.f32 1.0, %v1965_v7  ;;  %v2576_v16 = vpop.f32.mrf.mxu0 }
 0x14a   : > { %v1969_v18 = vpop.eup %1968  ;;  %v664_v22 = vmul.f32 %v1967_v9, %v2527_v17  ;;  %1994 = vpow2.f32 %v1620_v8  ;;  %v1621_v24 = vmul.f32 -1.442695, %v2576_v16  ;;  %v693_v35 = vpack.c.bf16 %v663_v12, %v661_v27 }
 0x14b   : > { %v1971_v26 = vpop.eup %1970  ;;  %1996 = vrcp.f32 %v575_v14  ;;  %v576_v29 = vadd.f32 1.0, %v1969_v18  ;;  %v2582_v30 = vpop.f32.mrf.mxu0 }
 0x14c   : > { %v1973_v15 = vpop.eup %1972  ;;  %1998 = vpow2.f32 %v1621_v24  ;;  %v1622_v31 = vmul.f32 -1.442695, %v2582_v30  ;;  %v694_v33 = vpack.c.bf16 %v664_v22, %v662_v20  ;;  %v665_v57 = vmul.f32 %v1971_v26, %v2530_v19 }
 0x14d   : > { %v1975_v34 = vpop.eup %1974  ;;  %2000 = vrcp.f32 %v576_v29  ;;  %v577_v13 = vadd.f32 1.0, %v1973_v15  ;;  %v2585_v17 = vpop.f32.mrf.mxu0 }
 0x14e   : > { %v1977_v37 = vpop.eup %1976  ;;  %2002 = vpow2.f32 %v1622_v31  ;;  %v1623_v38 = vmul.f32 -1.442695, %v2585_v17  ;;  %933 = vmatprep.mubr.bf16.mxu1 %v694_v33  ;;  %v666_v51 = vmul.f32 %v1975_v34, %v2533_v21 }
 0x14f   : > { %v1979_v11 = vpop.eup %1978  ;;  %2004 = vrcp.f32 %v577_v13  ;;  %v578_v39 = vadd.f32 1.0, %v1977_v37  ;;  %v2588_v41 = vpop.f32.mrf.mxu0  ;;  %934 = vmatmul.mubr.bf16.vlgmr.msra.gmra.mxu1 %v693_v35 }
 0x150   : > { %v1981_v42 = vpop.eup %1980  ;;  %2006 = vpow2.f32 %v1623_v38  ;;  %v1624_v43 = vmul.f32 -1.442695, %v2588_v41  ;;  %1789 = vmatpush3.bf16.msra.mxu1 %v2515_v10  ;;  %v667_v46 = vmul.f32 %v1979_v11, %v2536_v23 }
 0x151   : > { %v1983_v45 = vpop.eup %1982  ;;  %2008 = vrcp.f32 %v578_v39  ;;  %v579_v47 = vadd.f32 1.0, %v1981_v42  ;;  %v2593_v49 = vpop.f32.mrf.mxu0 }
 0x152   : > { %v1985_v50 = vpop.eup %1984  ;;  %v668_v53 = vmul.f32 %v1983_v45, %v2539_v25  ;;  %2010 = vpow2.f32 %v1624_v43  ;;  %v1625_v54 = vmul.f32 -1.442695, %v2593_v49  ;;  %v695_v21 = vpack.c.bf16 %v667_v46, %v665_v57 }
 0x153   : > { %v1987_v55 = vpop.eup %1986  ;;  %2012 = vrcp.f32 %v579_v47  ;;  %v580_v10 = vadd.f32 1.0, %v1985_v50  ;;  %v2599_v58 = vpop.f32.mrf.mxu0 }
 0x154   : > { %v1989_v23 = vpop.eup %1988  ;;  %v696_v59 = vpack.c.bf16 %v668_v53, %v666_v51  ;;  %v581_v61 = vadd.f32 1.0, %v1987_v55  ;;  %2014 = vpow2.f32 %v1625_v54  ;;  %v1626_v62 = vmul.f32 -1.442695, %v2599_v58 }
 0x155   : > { %v1991_v63 = vpop.eup %1990  ;;  %2016 = vrcp.f32 %v580_v10  ;;  %v2602_v25 = vpop.f32.mrf.mxu0  ;;  %v669_v31 = vmul.f32 %v1989_v23, %v2542_v28 }
 0x156   : > { %v1993_v0 = vpop.eup %1992  ;;  %2018 = vrcp.f32 %v581_v61  ;;  %v582_v2 = vadd.f32 1.0, %v1991_v63  ;;  %v1627_v19 = vmul.f32 -1.442695, %v2602_v25  ;;  %943 = vmatprep.mubr.bf16.mxu1 %v696_v59 }
 0x157   : > { %v1995_v3 = vpop.eup %1994  ;;  %2020 = vpow2.f32 %v1626_v62  ;;  %v2605_v4 = vpop.f32.mrf.mxu0  ;;  %944 = vmatmul.mubr.bf16.gmra.mxu1 %v695_v21  ;;  %v670_v26 = vmul.f32 %v1993_v0, %v2545_v32 }
 0x158   : > { %v1997_v5 = vpop.eup %1996  ;;  %2022 = vrcp.f32 %v582_v2  ;;  %v583_v7 = vadd.f32 1.0, %v1995_v3  ;;  %v1628_v8 = vmul.f32 -1.442695, %v2605_v4 }
 0x159   : > { %v1999_v9 = vpop.eup %1998  ;;  %2024 = vpow2.f32 %v1627_v19  ;;  %v2608_v12 = vpop.f32.mrf.mxu0  ;;  %v671_v18 = vmul.f32 %v1997_v5, %v2548_v36 }
 0x15a   : > { %v2001_v14 = vpop.eup %2000  ;;  %2026 = vrcp.f32 %v583_v7  ;;  %v584_v20 = vadd.f32 1.0, %v1999_v9  ;;  %v1629_v22 = vmul.f32 -1.442695, %v2608_v12 }
 0x15b   : > { %v2003_v24 = vpop.eup %2002  ;;  %v672_v27 = vmul.f32 %v2001_v14, %v2551_v40  ;;  %2028 = vpow2.f32 %v1628_v8  ;;  %v2614_v29 = vpop.f32.mrf.mxu0  ;;  %v697_v38 = vpack.c.bf16 %v671_v18, %v669_v31 }
 0x15c   : > { %v2005_v15 = vpop.eup %2004  ;;  %2030 = vrcp.f32 %v584_v20  ;;  %v585_v33 = vadd.f32 1.0, %v2003_v24  ;;  %v1630_v34 = vmul.f32 -1.442695, %v2614_v29 }
 0x15d   : > { %v2007_v36 = vpop.eup %2006  ;;  %v698_v35 = vpack.c.bf16 %v672_v27, %v670_v26  ;;  %2032 = vpow2.f32 %v1629_v22  ;;  %v2618_v13 = vpop.f32.mrf.mxu0  ;;  %v673_v23 = vmul.f32 %v2005_v15, %v2554_v44 }
 0x15e   : > { %v2009_v37 = vpop.eup %2008  ;;  %2034 = vrcp.f32 %v585_v33  ;;  %v586_v32 = vadd.f32 1.0, %v2007_v36  ;;  %v1631_v40 = vmul.f32 -1.442695, %v2618_v13 }
 0x15f   : > { %v2011_v11 = vpop.eup %2010  ;;  %2036 = vpow2.f32 %v1630_v34  ;;  %953 = vmatprep.mubr.bf16.mxu1 %v698_v35  ;;  %v2621_v39 = vpop.f32.mrf.mxu0  ;;  %v674_v55 = vmul.f32 %v2009_v37, %v2557_v48 }
 0x160   : > { %v2013_v28 = vpop.eup %2012  ;;  %2038 = vrcp.f32 %v586_v32  ;;  %v587_v42 = vadd.f32 1.0, %v2011_v11  ;;  %v1632_v43 = vmul.f32 -1.442695, %v2621_v39  ;;  %954 = vmatmul.mubr.bf16.gmra.mxu1 %v697_v38 }
 0x161   : > { %v2015_v45 = vpop.eup %2014  ;;  %2040 = vpow2.f32 %v1631_v40  ;;  %v2624_v46 = vpop.f32.mrf.mxu0  ;;  %v675_v50 = vmul.f32 %v2013_v28, %v2560_v52 }
 0x162   : > { %v2017_v47 = vpop.eup %2016  ;;  %2042 = vrcp.f32 %v587_v42  ;;  %v588_v51 = vadd.f32 1.0, %v2015_v45  ;;  %v1633_v53 = vmul.f32 -1.442695, %v2624_v46 }
 0x163   : > { %v2019_v54 = vpop.eup %2018  ;;  %v676_v57 = vmul.f32 %v2017_v47, %v2563_v56  ;;  %2044 = vpow2.f32 %v1632_v43  ;;  %v699_v63 = vpack.c.bf16 %v675_v50, %v673_v23  ;;  %v1931_v23 = vld [vmem:[%s2872_s3 + $0x18] sm:$0xff]  }
 0x164   : > { %v2021_v10 = vpop.eup %2020  ;;  %2046 = vrcp.f32 %v588_v51  ;;  %v677_v14 = vmul.f32 %v2019_v54, %v2566_v60 }
 0x165   : > { %v2023_v59 = vpop.eup %2022  ;;  %v700_v61 = vpack.c.bf16 %v676_v57, %v674_v55  ;;  %2048 = vpow2.f32 %v1633_v53  ;;  %v589_v2 = vadd.f32 1.0, %v2021_v10  ;;  %v1925_v57 = vld [vmem:[%s2872_s3 + $0x30] sm:$0xff]   ;;  %v1930_v10 = vld [vmem:[%s2872_s3 + $0x58] sm:$0xff]  }
 0x166   : > { %v2025_v62 = vpop.eup %2024  ;;  %v678_v56 = vmul.f32 %v2023_v59, %v2569_v1  ;;  %v1932_v59 = vld [vmem:[%s2872_s3 + $0x50] sm:$0xff]  }
 0x167   : > { %v2027_v52 = vpop.eup %2026  ;;  %v590_v21 = vadd.f32 1.0, %v2025_v62  ;;  %963 = vmatprep.mubr.bf16.mxu1 %v700_v61  ;;  %v1933_v61 = vld [vmem:[%s2872_s3 + $0x10] sm:$0xff]   ;;  %v1934_v62 = vld [vmem:[%s2872_s3 + $0x48] sm:$0xff]  }
 0x168   : > { %v2029_v0 = vpop.eup %2028  ;;  %964 = vmatmul.mubr.bf16.gmra.mxu1 %v699_v63  ;;  %v679_v5 = vmul.f32 %v2027_v52, %v2572_v6  ;;  %v1935_v63 = vld [vmem:[%s2872_s3 + $0x8] sm:$0xff]   ;;  %v1936_v52 = vld [vmem:[%s2872_s3 + $0x40] sm:$0xff]  }
 0x169   : > { %v2031_v19 = vpop.eup %2030  ;;  %v591_v48 = vadd.f32 1.0, %v2029_v0  ;;  %2050 = vrcp.f32 %v590_v21  ;;  %v1937_v21 = vld [vmem:[%s2872_s3] sm:$0xff]  }
 0x16a   : > { %v2033_v3 = vpop.eup %2032  ;;  %v680_v44 = vmul.f32 %v2031_v19, %v2576_v16  ;;  %v701_v24 = vpack.c.bf16 %v679_v5, %v677_v14 }
 0x16b   : > { %v2035_v7 = vpop.eup %2034  ;;  %2052 = vrcp.f32 %v591_v48  ;;  %v592_v8 = vadd.f32 1.0, %v2033_v3 }
 0x16c   : > { %v2037_v9 = vpop.eup %2036  ;;  %v702_v18 = vpack.c.bf16 %v680_v44, %v678_v56  ;;  %2054 = vrcp.f32 %v589_v2  ;;  %v681_v35 = vmul.f32 %v2035_v7, %v2582_v30 }
 0x16d   : > { %v2039_v20 = vpop.eup %2038  ;;  %2056 = vrcp.f32 %v592_v8  ;;  %v593_v6 = vadd.f32 1.0, %v2037_v9 }
 0x16e   : > { %v2041_v22 = vpop.eup %2040  ;;  %973 = vmatprep.mubr.bf16.mxu1 %v702_v18  ;;  %v682_v33 = vmul.f32 %v2039_v20, %v2585_v17 }
 0x16f   : > { %v2043_v26 = vpop.eup %2042  ;;  %v594_v1 = vadd.f32 1.0, %v2041_v22 }
 0x170   : > { %v2045_v27 = vpop.eup %2044  ;;  %974 = vmatmul.mubr.bf16.gmra.mxu1 %v701_v24  ;;  %v683_v34 = vmul.f32 %v2043_v26, %v2588_v41 }
 0x171   : > { %v2047_v16 = vpop.eup %2046  ;;  %v595_v15 = vadd.f32 1.0, %v2045_v27  ;;  %2058 = vrcp.f32 %v594_v1 }
 0x172   : > { %v2049_v31 = vpop.eup %2048  ;;  %v684_v60 = vmul.f32 %v2047_v16, %v2593_v49  ;;  %v703_v38 = vpack.c.bf16 %v683_v34, %v681_v35 }
 0x173   : > { %2060 = vrcp.f32 %v595_v15  ;;  %v596_v36 = vadd.f32 1.0, %v2049_v31 }
 0x174   : > { %v704_v37 = vpack.c.bf16 %v684_v60, %v682_v33  ;;  %2062 = vrcp.f32 %v593_v6 }
 0x175   : > { %2064 = vrcp.f32 %v596_v36 }
 0x176   : > { %983 = vmatprep.mubr.bf16.mxu1 %v704_v37  ;;  %v2051_v32 = vpop.eup %2050 }
 0x177   : > { %v686_v41 = vmul.f32 %v2051_v32, %v2602_v25 }
 0x178   : > { %v2053_v40 = vpop.eup %2052  ;;  %984 = vmatmul.mubr.bf16.gmra.mxu1 %v703_v38 }
 0x179   : > { %v2055_v11 = vpop.eup %2054  ;;  %v687_v17 = vmul.f32 %v2053_v40, %v2605_v4 }
 0x17a   : > { %v2057_v28 = vpop.eup %2056  ;;  %v685_v42 = vmul.f32 %v2055_v11, %v2599_v58  ;;  %v1924_v58 = vld [vmem:[%s2872_s3 + $0x70] sm:$0xff]  }
 0x17b   : > { %v688_v49 = vmul.f32 %v2057_v28, %v2608_v12  ;;  %1719 = vmatprep.subr.bf16.mxu0 %v1924_v58  ;;  %1782 = vmatprep.subr.bf16.mxu1 %v1924_v58 }
 0x17c   : > { %v705_v30 = vpack.c.bf16 %v687_v17, %v685_v42  ;;  %1720 = vmatpush3.bf16.msra.mxu0 %v1925_v57  ;;  %1790 = vmatpush3.bf16.msra.mxu1 %v1925_v57 }
 0x17d   : > { %v706_v43 = vpack.c.bf16 %v688_v49, %v686_v41 }
 0x17e   : > { %v2059_v45 = vpop.eup %2058 }
 0x17f   : > { %993 = vmatprep.mubr.bf16.mxu1 %v706_v43  ;;  %v690_v54 = vmul.f32 %v2059_v45, %v2618_v13  ;;  %v1927_v13 = vld [vmem:[%s2872_s3 + $0x28] sm:$0xff]  }
 0x180   : > { %v2061_v47 = vpop.eup %2060  ;;  %994 = vmatmul.mubr.bf16.gmra.mxu1 %v705_v30 }
 0x181   : > { %v2063_v50 = vpop.eup %2062  ;;  %v691_v53 = vmul.f32 %v2061_v47, %v2621_v39  ;;  %v1928_v39 = vld [vmem:[%s2872_s3 + $0x60] sm:$0xff]  }
 0x182   : > { %v2065_v51 = vpop.eup %2064  ;;  %v689_v25 = vmul.f32 %v2063_v50, %v2614_v29  ;;  %v1926_v29 = vld [vmem:[%s2872_s3 + $0x68] sm:$0xff]  }
 0x183   : > { %v692_v4 = vmul.f32 %v2065_v51, %v2624_v46  ;;  %1721 = vmatprep.subr.bf16.mxu0 %v1926_v29  ;;  %1783 = vmatprep.subr.bf16.mxu1 %v1926_v29  ;;  %v1929_v46 = vld [vmem:[%s2872_s3 + $0x20] sm:$0xff]  }
 0x184   : > { %v707_v12 = vpack.c.bf16 %v691_v53, %v689_v25  ;;  %1722 = vmatpush3.bf16.msra.mxu0 %v1927_v13  ;;  %1791 = vmatpush3.bf16.msra.mxu1 %v1927_v13 }
 0x185   : > { %v708_v55 = vpack.c.bf16 %v692_v4, %v690_v54  ;;  %1723 = vmatprep.subr.bf16.mxu0 %v1928_v39  ;;  %1784 = vmatprep.subr.bf16.mxu1 %v1928_v39 }
 0x187   : > { %1003 = vmatprep.mubr.bf16.mxu1 %v708_v55 }
 0x188   : > { %1004 = vmatmul.mubr.bf16.gmra.mxu1 %v707_v12  ;;  %1724 = vmatpush3.bf16.msra.mxu0 %v1929_v46 }
 0x189   : > { %1792 = vmatpush3.bf16.msra.mxu1 %v1929_v46  ;;  %1725 = vmatprep.subr.bf16.mxu0 %v1930_v10 }
 0x18a   : > { %1785 = vmatprep.subr.bf16.mxu1 %v1930_v10 }
 0x18c   : > { %1726 = vmatpush3.bf16.msra.mxu0 %v1931_v23 }
 0x18d   : > { %1793 = vmatpush3.bf16.msra.mxu1 %v1931_v23  ;;  %1727 = vmatprep.subr.bf16.mxu0 %v1932_v59 }
 0x18e   : > { %1786 = vmatprep.subr.bf16.mxu1 %v1932_v59 }
 0x190   : > { %1728 = vmatpush3.bf16.msra.mxu0 %v1933_v61 }
 0x191   : > { %1794 = vmatpush3.bf16.msra.mxu1 %v1933_v61  ;;  %1729 = vmatprep.subr.bf16.mxu0 %v1934_v62 }
 0x192   : > { %1787 = vmatprep.subr.bf16.mxu1 %v1934_v62 }
 0x194   : > { %1730 = vmatpush3.bf16.msra.mxu0 %v1935_v63 }
 0x195   : > { %1795 = vmatpush3.bf16.msra.mxu1 %v1935_v63  ;;  %1731 = vmatprep.subr.bf16.mxu0 %v1936_v52 }
 0x196   : > { %1788 = vmatprep.subr.bf16.mxu1 %v1936_v52 }
 0x198   : > { %1732 = vmatpush3.bf16.msra.mxu0 %v1937_v21 }
 0x199   : > { %1796 = vmatpush3.bf16.msra.mxu1 %v1937_v21 }
 0x20f   : > { %v2689_v0 = vpop.f32.mrf.mxu1 }
 0x210   : > { %v1666_v2 = vmul.f32 -1.442695, %v2689_v0 }
 0x211   : > { %v2692_v19 = vpop.f32.mrf.mxu1 }
 0x212   : > { %2066 = vpow2.f32 %v1666_v2  ;;  %v1667_v48 = vmul.f32 -1.442695, %v2692_v19 }
 0x213   : > { %v2695_v3 = vpop.f32.mrf.mxu1 }
 0x214   : > { %2068 = vpow2.f32 %v1667_v48  ;;  %v1668_v56 = vmul.f32 -1.442695, %v2695_v3 }
 0x215   : > { %v2698_v5 = vpop.f32.mrf.mxu1 }
 0x216   : > { %2070 = vpow2.f32 %v1668_v56  ;;  %v1669_v44 = vmul.f32 -1.442695, %v2698_v5 }
 0x217   : > { %v2701_v7 = vpop.f32.mrf.mxu1 }
 0x218   : > { %2072 = vpow2.f32 %v1669_v44  ;;  %v1670_v8 = vmul.f32 -1.442695, %v2701_v7 }
 0x219   : > { %v2704_v9 = vpop.f32.mrf.mxu1 }
 0x21a   : > { %2074 = vpow2.f32 %v1670_v8  ;;  %v1671_v14 = vmul.f32 -1.442695, %v2704_v9 }
 0x21b   : > { %v2707_v18 = vpop.f32.mrf.mxu1 }
 0x21c   : > { %2076 = vpow2.f32 %v1671_v14  ;;  %v1672_v20 = vmul.f32 -1.442695, %v2707_v18 }
 0x21d   : > { %v2710_v22 = vpop.f32.mrf.mxu1 }
 0x21e   : > { %2078 = vpow2.f32 %v1672_v20  ;;  %v1673_v24 = vmul.f32 -1.442695, %v2710_v22 }
 0x21f   : > { %v2067_v26 = vpop.eup %2066 }
 0x220   : > { %v1110_v1 = vadd.f32 1.0, %v2067_v26  ;;  %2080 = vpow2.f32 %v1673_v24  ;;  %v2713_v27 = vpop.f32.mrf.mxu1 }
 0x221   : > { %v2069_v6 = vpop.eup %2068  ;;  %v1674_v16 = vmul.f32 -1.442695, %v2713_v27 }
 0x222   : > { %2082 = vrcp.f32 %v1110_v1  ;;  %v1111_v15 = vadd.f32 1.0, %v2069_v6  ;;  %v2716_v31 = vpop.f32.mrf.mxu1 }
 0x223   : > { %v2071_v33 = vpop.eup %2070  ;;  %2084 = vpow2.f32 %v1674_v16  ;;  %v1675_v34 = vmul.f32 -1.442695, %v2716_v31 }
 0x224   : > { %2086 = vrcp.f32 %v1111_v15  ;;  %v1112_v60 = vadd.f32 1.0, %v2071_v33  ;;  %v2719_v36 = vpop.f32.mrf.mxu1 }
 0x225   : > { %v2073_v35 = vpop.eup %2072  ;;  %2088 = vpow2.f32 %v1675_v34  ;;  %v1676_v37 = vmul.f32 -1.442695, %v2719_v36 }
 0x226   : > { %2090 = vrcp.f32 %v1112_v60  ;;  %v1113_v38 = vadd.f32 1.0, %v2073_v35  ;;  %v2722_v32 = vpop.f32.mrf.mxu1 }
 0x227   : > { %v2075_v40 = vpop.eup %2074  ;;  %2092 = vpow2.f32 %v1676_v37  ;;  %v1677_v11 = vmul.f32 -1.442695, %v2722_v32 }
 0x228   : > { %2094 = vrcp.f32 %v1113_v38  ;;  %v1114_v28 = vadd.f32 1.0, %v2075_v40  ;;  %v2725_v17 = vpop.f32.mrf.mxu1 }
 0x229   : > { %v2077_v41 = vpop.eup %2076  ;;  %2096 = vpow2.f32 %v1677_v11  ;;  %v1678_v49 = vmul.f32 -1.442695, %v2725_v17 }
 0x22a   : > { %2098 = vrcp.f32 %v1114_v28  ;;  %v1115_v42 = vadd.f32 1.0, %v2077_v41  ;;  %v2728_v43 = vpop.f32.mrf.mxu1 }
 0x22b   : > { %v2079_v30 = vpop.eup %2078  ;;  %2100 = vpow2.f32 %v1678_v49  ;;  %v1679_v45 = vmul.f32 -1.442695, %v2728_v43 }
 0x22c   : > { %2102 = vrcp.f32 %v1115_v42  ;;  %v1116_v47 = vadd.f32 1.0, %v2079_v30  ;;  %v2731_v50 = vpop.f32.mrf.mxu1 }
 0x22d   : > { %v2081_v51 = vpop.eup %2080  ;;  %2104 = vpow2.f32 %v1679_v45  ;;  %v1680_v53 = vmul.f32 -1.442695, %v2731_v50 }
 0x22e   : > { %2106 = vrcp.f32 %v1116_v47  ;;  %v1117_v54 = vadd.f32 1.0, %v2081_v51  ;;  %v2734_v4 = vpop.f32.mrf.mxu1 }
 0x22f   : > { %v2083_v25 = vpop.eup %2082  ;;  %2108 = vpow2.f32 %v1680_v53  ;;  %v1681_v55 = vmul.f32 -1.442695, %v2734_v4 }
 0x230   : > { %v2085_v12 = vpop.eup %2084  ;;  %2110 = vrcp.f32 %v1117_v54  ;;  %v2737_v58 = vpop.f32.mrf.mxu1  ;;  %v1206_v20 = vmul.f32 %v2083_v25, %v2689_v0 }
 0x231   : > { %v2087_v57 = vpop.eup %2086  ;;  %v1118_v29 = vadd.f32 1.0, %v2085_v12  ;;  %2112 = vpow2.f32 %v1681_v55  ;;  %v1682_v13 = vmul.f32 -1.442695, %v2737_v58 }
 0x232   : > { %v2089_v39 = vpop.eup %2088  ;;  %v2740_v46 = vpop.f32.mrf.mxu1  ;;  %v1207_v56 = vmul.f32 %v2087_v57, %v2692_v19 }
 0x233   : > { %v2091_v10 = vpop.eup %2090  ;;  %2114 = vrcp.f32 %v1118_v29  ;;  %v1119_v23 = vadd.f32 1.0, %v2089_v39  ;;  %v1683_v59 = vmul.f32 -1.442695, %v2740_v46 }
 0x234   : > { %v2093_v61 = vpop.eup %2092  ;;  %2116 = vpow2.f32 %v1682_v13  ;;  %v2743_v62 = vpop.f32.mrf.mxu1  ;;  %v1208_v52 = vmul.f32 %v2091_v10, %v2695_v3 }
 0x235   : > { %v2095_v63 = vpop.eup %2094  ;;  %2118 = vrcp.f32 %v1119_v23  ;;  %v1120_v21 = vadd.f32 1.0, %v2093_v61  ;;  %v1684_v2 = vmul.f32 -1.442695, %v2743_v62 }
 0x236   : > { %v2097_v48 = vpop.eup %2096  ;;  %v1209_v44 = vmul.f32 %v2095_v63, %v2698_v5  ;;  %2120 = vpow2.f32 %v1683_v59  ;;  %v2749_v8 = vpop.f32.mrf.mxu1  ;;  %v1238_v15 = vpack.c.bf16 %v1208_v52, %v1206_v20 }
 0x237   : > { %v2099_v14 = vpop.eup %2098  ;;  %2122 = vrcp.f32 %v1120_v21  ;;  %v1121_v24 = vadd.f32 1.0, %v2097_v48  ;;  %v1685_v26 = vmul.f32 -1.442695, %v2749_v8 }
 0x238   : > { %v2101_v3 = vpop.eup %2100  ;;  %v1239_v1 = vpack.c.bf16 %v1209_v44, %v1207_v56  ;;  %2124 = vpow2.f32 %v1684_v2  ;;  %v2753_v6 = vpop.f32.mrf.mxu1  ;;  %v1210_v47 = vmul.f32 %v2099_v14, %v2701_v7 }
 0x239   : > { %v2103_v16 = vpop.eup %2102  ;;  %2126 = vrcp.f32 %v1121_v24  ;;  %v1122_v19 = vadd.f32 1.0, %v2101_v3  ;;  %v1686_v5 = vmul.f32 -1.442695, %v2753_v6 }
 0x23a   : > { %v2105_v33 = vpop.eup %2104  ;;  %2128 = vpow2.f32 %v1685_v26  ;;  %v2756_v34 = vpop.f32.mrf.mxu1  ;;  %1414 = vmatprep.mubr.bf16.mxu0 %v1239_v1  ;;  %v1211_v42 = vmul.f32 %v2103_v16, %v2704_v9 }
 0x23b   : > { %v2107_v0 = vpop.eup %2106  ;;  %2130 = vrcp.f32 %v1122_v19  ;;  %v1123_v60 = vadd.f32 1.0, %v2105_v33  ;;  %v1687_v35 = vmul.f32 -1.442695, %v2756_v34  ;;  %1415 = vmatmul.mubr.bf16.vlgmr.msra.gmra.mxu0 %v1238_v15 }
 0x23c   : > { %v2109_v37 = vpop.eup %2108  ;;  %2132 = vpow2.f32 %v1686_v5  ;;  %v2759_v38 = vpop.f32.mrf.mxu1  ;;  %v1212_v11 = vmul.f32 %v2107_v0, %v2707_v18 }
 0x23d   : > { %v2111_v40 = vpop.eup %2110  ;;  %2134 = vrcp.f32 %v1123_v60  ;;  %v1124_v28 = vadd.f32 1.0, %v2109_v37  ;;  %v1688_v41 = vmul.f32 -1.442695, %v2759_v38 }
 0x23e   : > { %v2113_v49 = vpop.eup %2112  ;;  %v1213_v30 = vmul.f32 %v2111_v40, %v2710_v22  ;;  %2136 = vpow2.f32 %v1687_v35  ;;  %v2765_v45 = vpop.f32.mrf.mxu1  ;;  %v1240_v12 = vpack.c.bf16 %v1212_v11, %v1210_v47 }
 0x23f   : > { %2138 = vrcp.f32 %v1124_v28  ;;  %v1125_v51 = vadd.f32 1.0, %v2113_v49  ;;  %v1689_v53 = vmul.f32 -1.442695, %v2765_v45 }
 0x240   : > { %v2115_v54 = vpop.eup %2114  ;;  %v1241_v18 = vpack.c.bf16 %v1213_v30, %v1211_v42  ;;  %2140 = vpow2.f32 %v1688_v41  ;;  %v2769_v25 = vpop.f32.mrf.mxu1 }
 0x241   : > { %v2117_v55 = vpop.eup %2116  ;;  %2142 = vrcp.f32 %v1125_v51  ;;  %v1690_v9 = vmul.f32 -1.442695, %v2769_v25  ;;  %v1214_v24 = vmul.f32 %v2115_v54, %v2713_v27 }
 0x242   : > { %v2119_v22 = vpop.eup %2118  ;;  %v1126_v57 = vadd.f32 1.0, %v2117_v55  ;;  %2144 = vpow2.f32 %v1689_v53  ;;  %v2772_v29 = vpop.f32.mrf.mxu1  ;;  %1422 = vmatprep.mubr.bf16.mxu0 %v1241_v18 }
 0x243   : > { %v2121_v7 = vpop.eup %2120  ;;  %2146 = vpow2.f32 %v1690_v9  ;;  %v1691_v13 = vmul.f32 -1.442695, %v2772_v29  ;;  %1423 = vmatmul.mubr.bf16.gmra.mxu0 %v1240_v12  ;;  %v1215_v56 = vmul.f32 %v2119_v22, %v2716_v31 }
 0x244   : > { %v2123_v39 = vpop.eup %2122  ;;  %2148 = vrcp.f32 %v1126_v57  ;;  %v1127_v10 = vadd.f32 1.0, %v2121_v7  ;;  %v2775_v23 = vpop.f32.mrf.mxu1 }
 0x245   : > { %v2125_v59 = vpop.eup %2124  ;;  %2150 = vpow2.f32 %v1691_v13  ;;  %v1692_v61 = vmul.f32 -1.442695, %v2775_v23  ;;  %v1216_v52 = vmul.f32 %v2123_v39, %v2719_v36 }
 0x246   : > { %v2127_v63 = vpop.eup %2126  ;;  %2152 = vrcp.f32 %v1127_v10  ;;  %v1128_v21 = vadd.f32 1.0, %v2125_v59  ;;  %v2779_v2 = vpop.f32.mrf.mxu1 }
 0x247   : > { %v2129_v48 = vpop.eup %2128  ;;  %v1217_v44 = vmul.f32 %v2127_v63, %v2722_v32  ;;  %2154 = vpow2.f32 %v1692_v61  ;;  %v1693_v14 = vmul.f32 -1.442695, %v2779_v2  ;;  %v1242_v19 = vpack.c.bf16 %v1216_v52, %v1214_v24 }
 0x248   : > { %v2131_v20 = vpop.eup %2130  ;;  %2156 = vrcp.f32 %v1128_v21  ;;  %v1129_v26 = vadd.f32 1.0, %v2129_v48  ;;  %v2785_v3 = vpop.f32.mrf.mxu1 }
 0x249   : > { %v2133_v36 = vpop.eup %2132  ;;  %v1243_v1 = vpack.c.bf16 %v1217_v44, %v1215_v56  ;;  %2158 = vpow2.f32 %v1693_v14  ;;  %v1694_v16 = vmul.f32 -1.442695, %v2785_v3  ;;  %v1218_v53 = vmul.f32 %v2131_v20, %v2725_v17 }
 0x24a   : > { %v2135_v15 = vpop.eup %2134  ;;  %2160 = vrcp.f32 %v1129_v26  ;;  %v1130_v31 = vadd.f32 1.0, %v2133_v36  ;;  %v2788_v32 = vpop.f32.mrf.mxu1 }
 0x24b   : > { %v2137_v5 = vpop.eup %2136  ;;  %2162 = vpow2.f32 %v1694_v16  ;;  %v1695_v33 = vmul.f32 -1.442695, %v2788_v32  ;;  %1430 = vmatprep.mubr.bf16.mxu0 %v1243_v1  ;;  %v1219_v42 = vmul.f32 %v2135_v15, %v2728_v43 }
 0x24c   : > { %v2139_v27 = vpop.eup %2138  ;;  %2164 = vrcp.f32 %v1130_v31  ;;  %v1131_v0 = vadd.f32 1.0, %v2137_v5  ;;  %v2791_v60 = vpop.f32.mrf.mxu1  ;;  %1431 = vmatmul.mubr.bf16.gmra.mxu0 %v1242_v19 }
 0x24d   : > { %v2141_v35 = vpop.eup %2140  ;;  %2166 = vpow2.f32 %v1695_v33  ;;  %v1696_v37 = vmul.f32 -1.442695, %v2791_v60  ;;  %v1220_v11 = vmul.f32 %v2139_v27, %v2731_v50 }
 0x24e   : > { %v2143_v40 = vpop.eup %2142  ;;  %2168 = vrcp.f32 %v1131_v0  ;;  %v1132_v28 = vadd.f32 1.0, %v2141_v35  ;;  %v2795_v41 = vpop.f32.mrf.mxu1 }
 0x24f   : > { %v2145_v49 = vpop.eup %2144  ;;  %v1221_v30 = vmul.f32 %v2143_v40, %v2734_v4  ;;  %2170 = vpow2.f32 %v1696_v37  ;;  %v1697_v47 = vmul.f32 -1.442695, %v2795_v41  ;;  %v1244_v12 = vpack.c.bf16 %v1220_v11, %v1218_v53 }
 0x250   : > { %v2147_v51 = vpop.eup %2146  ;;  %2172 = vrcp.f32 %v1132_v28  ;;  %v1133_v54 = vadd.f32 1.0, %v2145_v49 }
 0x251   : > { %v2149_v18 = vpop.eup %2148  ;;  %v1245_v55 = vpack.c.bf16 %v1221_v30, %v1219_v42  ;;  %2174 = vpow2.f32 %v1697_v47  ;;  %v1134_v57 = vadd.f32 1.0, %v2147_v51 }
 0x252   : > { %v2151_v50 = vpop.eup %2150  ;;  %2176 = vrcp.f32 %v1133_v54  ;;  %v1222_v21 = vmul.f32 %v2149_v18, %v2737_v58 }
 0x253   : > { %v2153_v9 = vpop.eup %2152  ;;  %v1135_v22 = vadd.f32 1.0, %v2151_v50  ;;  %1438 = vmatprep.mubr.bf16.mxu0 %v1245_v55 }
 0x254   : > { %v2155_v43 = vpop.eup %2154  ;;  %1439 = vmatmul.mubr.bf16.gmra.mxu0 %v1244_v12  ;;  %v1223_v61 = vmul.f32 %v2153_v9, %v2740_v46 }
 0x255   : > { %v2157_v4 = vpop.eup %2156  ;;  %v1136_v7 = vadd.f32 1.0, %v2155_v43  ;;  %2178 = vrcp.f32 %v1135_v22 }
 0x256   : > { %v2159_v13 = vpop.eup %2158  ;;  %v1224_v17 = vmul.f32 %v2157_v4, %v2743_v62 }
 0x257   : > { %v2161_v39 = vpop.eup %2160  ;;  %2180 = vrcp.f32 %v1136_v7  ;;  %v1137_v10 = vadd.f32 1.0, %v2159_v13 }
 0x258   : > { %v2163_v59 = vpop.eup %2162  ;;  %v1225_v63 = vmul.f32 %v2161_v39, %v2749_v8  ;;  %2182 = vrcp.f32 %v1134_v57  ;;  %v1246_v14 = vpack.c.bf16 %v1224_v17, %v1222_v21 }
 0x259   : > { %v2165_v52 = vpop.eup %2164  ;;  %2184 = vrcp.f32 %v1137_v10  ;;  %v1138_v26 = vadd.f32 1.0, %v2163_v59 }
 0x25a   : > { %v2167_v48 = vpop.eup %2166  ;;  %v1247_v56 = vpack.c.bf16 %v1225_v63, %v1223_v61  ;;  %v1226_v19 = vmul.f32 %v2165_v52, %v2753_v6 }
 0x25b   : > { %v2169_v44 = vpop.eup %2168  ;;  %v1139_v20 = vadd.f32 1.0, %v2167_v48 }
 0x25c   : > { %v2171_v24 = vpop.eup %2170  ;;  %1446 = vmatprep.mubr.bf16.mxu0 %v1247_v56  ;;  %v1227_v58 = vmul.f32 %v2169_v44, %v2756_v34 }
 0x25d   : > { %v2173_v62 = vpop.eup %2172  ;;  %v1140_v36 = vadd.f32 1.0, %v2171_v24  ;;  %1447 = vmatmul.mubr.bf16.gmra.mxu0 %v1246_v14  ;;  %2186 = vrcp.f32 %v1139_v20 }
 0x25e   : > { %v2175_v1 = vpop.eup %2174  ;;  %v1228_v8 = vmul.f32 %v2173_v62, %v2759_v38 }
 0x25f   : > { %v2177_v46 = vpop.eup %2176  ;;  %2188 = vrcp.f32 %v1140_v36  ;;  %v1141_v16 = vadd.f32 1.0, %v2175_v1 }
 0x260   : > { %v1229_v15 = vmul.f32 %v2177_v46, %v2765_v45  ;;  %2190 = vrcp.f32 %v1138_v26  ;;  %v1248_v33 = vpack.c.bf16 %v1228_v8, %v1226_v19 }
 0x261   : > { %2192 = vrcp.f32 %v1141_v16 }
 0x262   : > { %v1249_v31 = vpack.c.bf16 %v1229_v15, %v1227_v58  ;;  %v2179_v5 = vpop.eup %2178 }
 0x263   : > { %v1231_v37 = vmul.f32 %v2179_v5, %v2772_v29 }
 0x264   : > { %v2181_v27 = vpop.eup %2180  ;;  %1454 = vmatprep.mubr.bf16.mxu0 %v1249_v31 }
 0x265   : > { %v2183_v0 = vpop.eup %2182  ;;  %1455 = vmatmul.mubr.bf16.gmra.mxu0 %v1248_v33  ;;  %v1232_v38 = vmul.f32 %v2181_v27, %v2775_v23 }
 0x266   : > { %v2185_v35 = vpop.eup %2184  ;;  %v1230_v45 = vmul.f32 %v2183_v0, %v2769_v25 }
 0x267   : > { %v1233_v34 = vmul.f32 %v2185_v35, %v2779_v2 }
 0x268   : > { %v1250_v6 = vpack.c.bf16 %v1232_v38, %v1230_v45 }
 0x269   : > { %v1251_v40 = vpack.c.bf16 %v1233_v34, %v1231_v37 }
 0x26a   : > { %v2187_v11 = vpop.eup %2186 }
 0x26b   : > { %1462 = vmatprep.mubr.bf16.mxu1 %v1251_v40  ;;  %v1235_v47 = vmul.f32 %v2187_v11, %v2788_v32 }
 0x26c   : > { %v2189_v28 = vpop.eup %2188  ;;  %1463 = vmatmul.mubr.bf16.vlgmr.msra.gmra.mxu1 %v1250_v6 }
 0x26d   : > { %v2191_v49 = vpop.eup %2190  ;;  %v1236_v30 = vmul.f32 %v2189_v28, %v2791_v60 }
 0x26e   : > { %v2193_v42 = vpop.eup %2192  ;;  %v1234_v29 = vmul.f32 %v2191_v49, %v2785_v3 }
 0x26f   : > { %v1237_v23 = vmul.f32 %v2193_v42, %v2795_v41 }
 0x270   : > { %v1252_v51 = vpack.c.bf16 %v1236_v30, %v1234_v29 }
 0x271   : > { %v1253_v2 = vpack.c.bf16 %v1237_v23, %v1235_v47 }
 0x273   : > { %1470 = vmatprep.mubr.bf16.mxu1 %v1253_v2 }
 0x274   : > { %1471 = vmatmul.mubr.bf16.gmra.mxu1 %v1252_v51 }
 0x2fb   : > { %v1733_v25 = vpop.f32.mrf.mxu0 }
 0x2fd   : > { %v1734_v3 = vpop.f32.mrf.mxu0 }
 0x2fe   : > { %v1735_v32 = vadd.f32 %v1734_v3, %v1733_v25 }
 0x2ff   : > { %v1736_v60 = vpop.f32.mrf.mxu0 }
 0x300   : > { %1480 = vst.msk [vmem:[%s2822_s6] sm:$0xff] %vm1479_vm0, %v1735_v32 }
 0x301   : > { %v1737_v41 = vpop.f32.mrf.mxu0 }
 0x302   : > { %v1738_v53 = vadd.f32 %v1737_v41, %v1736_v60 }
 0x303   : > { %v1739_v54 = vpop.f32.mrf.mxu0 }
 0x304   : > { %1481 = vst.msk [vmem:[%s2822_s6 + $0x8] sm:$0xff] %vm1479_vm0, %v1738_v53 }
 0x305   : > { %v1740_v18 = vpop.f32.mrf.mxu0 }
 0x306   : > { %v1741_v55 = vadd.f32 %v1740_v18, %v1739_v54 }
 0x307   : > { %v1742_v50 = vpop.f32.mrf.mxu0 }
 0x308   : > { %1482 = vst.msk [vmem:[%s2822_s6 + $0x10] sm:$0xff] %vm1479_vm0, %v1741_v55 }
 0x309   : > { %v1743_v12 = vpop.f32.mrf.mxu0 }
 0x30a   : > { %v1744_v9 = vadd.f32 %v1743_v12, %v1742_v50 }
 0x30c   : > { %1483 = vst.msk [vmem:[%s2822_s6 + $0x18] sm:$0xff] %vm1479_vm0, %v1744_v9  ;;  %v1745_v22 = vpop.f32.mrf.mxu0 }
 0x30e   : > { %v1746_v43 = vpop.f32.mrf.mxu0 }
 0x30f   : > { %v1747_v57 = vadd.f32 %v1746_v43, %v1745_v22 }
 0x310   : > { %v1748_v4 = vpop.f32.mrf.mxu0 }
 0x311   : > { %1484 = vst.msk [vmem:[%s2822_s6 + $0x20] sm:$0xff] %vm1479_vm0, %v1747_v57 }
 0x312   : > { %v1749_v7 = vpop.f32.mrf.mxu0 }
 0x313   : > { %v1750_v13 = vadd.f32 %v1749_v7, %v1748_v4 }
 0x314   : > { %v1751_v39 = vpop.f32.mrf.mxu0 }
 0x315   : > { %1485 = vst.msk [vmem:[%s2822_s6 + $0x28] sm:$0xff] %vm1479_vm0, %v1750_v13 }
 0x316   : > { %v1752_v17 = vpop.f32.mrf.mxu0 }
 0x317   : > { %v1753_v10 = vadd.f32 %v1752_v17, %v1751_v39 }
 0x318   : > { %v1754_v59 = vpop.f32.mrf.mxu0 }
 0x319   : > { %1486 = vst.msk [vmem:[%s2822_s6 + $0x30] sm:$0xff] %vm1479_vm0, %v1753_v10 }
 0x31a   : > { %v1755_v61 = vpop.f32.mrf.mxu0 }
 0x31b   : > { %v1756_v63 = vadd.f32 %v1755_v61, %v1754_v59 }
 0x31d   : > { %1487 = vst.msk [vmem:[%s2822_s6 + $0x38] sm:$0xff] %vm1479_vm0, %v1756_v63  ;;  %v1757_v52 = vpop.f32.mrf.mxu0 }
 0x31f   : > { %v1758_v21 = vpop.f32.mrf.mxu0 }
 0x320   : > { %v1759_v48 = vadd.f32 %v1758_v21, %v1757_v52 }
 0x321   : > { %v1760_v56 = vpop.f32.mrf.mxu0 }
 0x322   : > { %1488 = vst.msk [vmem:[%s2822_s6 + $0x40] sm:$0xff] %vm1479_vm0, %v1759_v48 }
 0x323   : > { %v1761_v44 = vpop.f32.mrf.mxu0 }
 0x324   : > { %v1762_v14 = vadd.f32 %v1761_v44, %v1760_v56 }
 0x325   : > { %v1763_v20 = vpop.f32.mrf.mxu0 }
 0x326   : > { %1489 = vst.msk [vmem:[%s2822_s6 + $0x48] sm:$0xff] %vm1479_vm0, %v1762_v14 }
 0x327   : > { %v1764_v24 = vpop.f32.mrf.mxu0 }
 0x328   : > { %v1765_v26 = vadd.f32 %v1764_v24, %v1763_v20 }
 0x329   : > { %v1766_v62 = vpop.f32.mrf.mxu0 }
 0x32a   : > { %1490 = vst.msk [vmem:[%s2822_s6 + $0x50] sm:$0xff] %vm1479_vm0, %v1765_v26 }
 0x32b   : > { %v1767_v36 = vpop.f32.mrf.mxu0 }
 0x32c   : > { %v1768_v1 = vadd.f32 %v1767_v36, %v1766_v62  ;;  %v1769_v46 = vpop.f32.mrf.mxu1 }
 0x32e   : > { %1491 = vst.msk [vmem:[%s2822_s6 + $0x58] sm:$0xff] %vm1479_vm0, %v1768_v1  ;;  %v1770_v8 = vpop.f32.mrf.mxu1 }
 0x32f   : > { %v1771_v16 = vadd.f32 %v1770_v8, %v1769_v46 }
 0x330   : > { %v1772_v58 = vpop.f32.mrf.mxu1 }
 0x331   : > { %1492 = vst.msk [vmem:[%s2822_s6 + $0x60] sm:$0xff] %vm1479_vm0, %v1771_v16 }
 0x332   : > { %v1773_v15 = vpop.f32.mrf.mxu1 }
 0x333   : > { %v1774_v19 = vadd.f32 %v1773_v15, %v1772_v58 }
 0x334   : > { %v1775_v31 = vpop.f32.mrf.mxu1 }
 0x335   : > { %1493 = vst.msk [vmem:[%s2822_s6 + $0x68] sm:$0xff] %vm1479_vm0, %v1774_v19 }
 0x336   : > { %v1776_v5 = vpop.f32.mrf.mxu1 }
 0x337   : > { %v1777_v33 = vadd.f32 %v1776_v5, %v1775_v31 }
 0x338   : > { %v1778_v27 = vpop.f32.mrf.mxu1 }
 0x339   : > { %1494 = vst.msk [vmem:[%s2822_s6 + $0x70] sm:$0xff] %vm1479_vm0, %v1777_v33 }
 0x33a   : > { %v1779_v0 = vpop.f32.mrf.mxu1 }
 0x33b   : > { %v1780_v35 = vadd.f32 %v1779_v0, %v1778_v27 }
 0x33d   : > { %1495 = vst.msk [vmem:[%s2822_s6 + $0x78] sm:$0xff] %vm1479_vm0, %v1780_v35 }
 0x33e PF: > { %p15_p7 = scmp.ge.s32.totalorder %s2365_s26, 4   ;;  %s2886_s15 = smov %s2278_s16 }
 0x33f   : > { %s2887_s16 = smov %s2282_s17  ;;  %s2888_s17 = smov %s2385_s8 }
 0x340   : > { %s2889_s18 = smov %s2365_s26  ;;  %17 = sbr.rel (!%p15_p7) target bundleno = 4 (0x4), region = 80 }
 0x345   :  { %1518 = vsyncpa [#allocation3], 1 }
 0x346   :  { %1520 = vsyncpa [#allocation3 + $0x1], 1 }
 0x347   :  { %1521 = vsyncpa [#allocation5], 1 }

</bundles_post_ra>
